<compile_context>
chip_gen: v5e
topology: v5e:2x2
jax: 0.10.0
libtpu: 0.0.40
codegen_flags: <defaults>
</compile_context>

<pallas_src>
import jax
import jax.numpy as jnp
from jax.experimental import pallas as pl
from jax.experimental.pallas import tpu as pltpu

_LANES = 128          # vreg lane width
_SUBLANES = 8         # vreg sublane count (f32)
_MAX_TILE_ROWS = 512  # 512 x 128 x 4B = 256 KiB per f32 block


# ---------------------------------------------------------------------------
# Kernels
# ---------------------------------------------------------------------------
def _copy_pair_kernel(a_ref, b_ref, oa_ref, ob_ref):
    # Template body for a real noise layer; Identity is a straight copy.
    oa_ref[...] = a_ref[...]
    ob_ref[...] = b_ref[...]


def _copy_one_kernel(a_ref, oa_ref):
    oa_ref[...] = a_ref[...]


# ---------------------------------------------------------------------------
# Lane-dense reshape helpers
# ---------------------------------------------------------------------------
def _as_lane_dense_2d(x):
    """Flatten x to a lane-dense (rows, 128) slab (pads only if size % 128 != 0)."""
    total = x.size
    pad = (-total) % _LANES
    flat = x.reshape(-1)
    if pad:
        flat = jnp.pad(flat, (0, pad))
    return flat.reshape((total + pad) // _LANES, _LANES), pad


def _from_lane_dense_2d(y2d, pad, orig):
    flat = y2d.reshape(-1)
    if pad:
        flat = flat[: orig.size]
    return flat.reshape(orig.shape)


def _tile_rows(rows):
    """Pick a row tile that satisfies the (8, 128) tiling rule."""
    if rows % _SUBLANES == 0:
        return min(rows, _MAX_TILE_ROWS)  # both are multiples of 8
    return rows  # full-extent block is always legal


# ---------------------------------------------------------------------------
# Pallas wrappers
# ---------------------------------------------------------------------------
def _pallas_copy_pair(a, b):
    """One fused pallas_call copying both tensors (same shape/dtype)."""
    a2, pad = _as_lane_dense_2d(a)
    b2, _ = _as_lane_dense_2d(b)
    rows = a2.shape[0]
    tr = _tile_rows(rows)
    spec = pl.BlockSpec((tr, _LANES), lambda i: (i, 0))
    oa2, ob2 = pl.pallas_call(
        _copy_pair_kernel,
        out_shape=(
            jax.ShapeDtypeStruct(a2.shape, a2.dtype),
            jax.ShapeDtypeStruct(b2.shape, b2.dtype),
        ),
        grid=(pl.cdiv(rows, tr),),
        in_specs=[spec, spec],
        out_specs=(spec, spec),
        compiler_params=pltpu.CompilerParams(
            dimension_semantics=("parallel",),  # v7x: shard rows across 2 TCs
        ),
    )(a2, b2)
    return _from_lane_dense_2d(oa2, pad, a), _from_lane_dense_2d(ob2, pad, b)


def _pallas_copy_one(a):
    a2, pad = _as_lane_dense_2d(a)
    rows = a2.shape[0]
    tr = _tile_rows(rows)
    spec = pl.BlockSpec((tr, _LANES), lambda i: (i, 0))
    oa2 = pl.pallas_call(
        _copy_one_kernel,
        out_shape=jax.ShapeDtypeStruct(a2.shape, a2.dtype),
        grid=(pl.cdiv(rows, tr),),
        in_specs=[spec],
        out_specs=spec,
        compiler_params=pltpu.CompilerParams(
            dimension_semantics=("parallel",),
        ),
    )(a2)
    return _from_lane_dense_2d(oa2, pad, a)


# ---------------------------------------------------------------------------
# Module port
# ---------------------------------------------------------------------------
class Identity:
    """JAX/Pallas equivalent of the HiDDeN Identity noise layer.

    By default a true no-op (zero HBM traffic).  With use_pallas_copy=True it
    routes the pair through the fused lane-dense Pallas copy kernel, which is
    the structural template for real noise layers.
    """

    def __init__(self, use_pallas_copy: bool = False):
        self.use_pallas_copy = use_pallas_copy

    def __call__(self, noised_and_cover):
        noised, cover = noised_and_cover
        if not self.use_pallas_copy:
            return [noised, cover]  # semantic no-op: return inputs unchanged
        if noised.shape == cover.shape and noised.dtype == cover.dtype:
            out_n, out_c = _pallas_copy_pair(noised, cover)
        else:
            out_n = _pallas_copy_one(noised)
            out_c = _pallas_copy_one(cover)
        return [out_n, out_c]


class Noiser:
    """
    JAX/Pallas port of Noiser.  noise_layers[0] is always Identity(), and the
    forward pass only ever invokes noise_layers[0].
    """

    def __init__(self, noise_layers=None, use_pallas_copy: bool = False):
        self.noise_layers = [Identity(use_pallas_copy=use_pallas_copy)]
        if noise_layers:
            for layer in noise_layers:
                # TODO(synk): JpegPlaceholder / QuantizationPlaceholder layers are
                # never reached by forward() (it always uses layer 0); not ported.
                self.noise_layers.append(layer)

    def forward(self, encoded_and_cover):
        random_noise_layer = self.noise_layers[0]
        return random_noise_layer(encoded_and_cover)

    __call__ = forward


# ---------------------------------------------------------------------------
# Self-test
# ---------------------------------------------------------------------------
if __name__ == "__main__":
    key = jax.random.PRNGKey(0)
    k1, k2 = jax.random.split(key)
    encoded = jax.random.normal(k1, (2, 4, 16, 16), dtype=jnp.float32)
    cover = jax.random.normal(k2, (2, 4, 16, 16), dtype=jnp.float32)

    # Default forward: true no-op Identity (top perf recommendation).
    noiser = Noiser(noise_layers=[])
    out_encoded, out_cover = noiser([encoded, cover])
    jax.block_until_ready(out_encoded)
    jax.block_until_ready(out_cover)
    assert out_encoded.shape == encoded.shape and out_encoded.dtype == encoded.dtype
    assert out_cover.shape == cover.shape and out_cover.dtype == cover.dtype
    assert bool(jnp.all(out_encoded == encoded))
    assert bool(jnp.all(out_cover == cover))

    # Pallas-kernel path: fused lane-dense tiled copy (template for real noise layers).
    noiser_k = Noiser(noise_layers=[], use_pallas_copy=True)
    ke, kc = noiser_k([encoded, cover])
    jax.block_until_ready(ke)
    jax.block_until_ready(kc)
    assert ke.shape == encoded.shape and ke.dtype == encoded.dtype
    assert kc.shape == cover.shape and kc.dtype == cover.dtype
    assert bool(jnp.all(ke == encoded))
    assert bool(jnp.all(kc == cover))

    # Also exercise the non-128-divisible fallback (padding + full-extent block).
    odd = jax.random.normal(key, (2, 3, 5, 7), dtype=jnp.float32)
    odd_out = _pallas_copy_one(odd)
    jax.block_until_ready(odd_out)
    assert bool(jnp.all(odd_out == odd))

    print("KERNEL_OK")
</pallas_src>

<mosaic_0001>
module attributes {stable_mosaic.version = 11 : i64} {
  func.func @_copy_pair_kernel(%arg0: i32, %arg1: memref<16x128xf32, #tpu.memory_space<vmem>>, %arg2: memref<16x128xf32, #tpu.memory_space<vmem>>, %arg3: memref<16x128xf32, #tpu.memory_space<vmem>>, %arg4: memref<16x128xf32, #tpu.memory_space<vmem>>) attributes {dimension_semantics = [#tpu.dimension_semantics<parallel>], iteration_bounds = array<i64: 1>, scalar_prefetch = 0 : i64, scratch_operands = 0 : i64, tpu.core_type = #tpu.core_type<tc>, window_params = [{transform_indices = @transform_0, window_bounds = array<i64: 16, 128>}, {transform_indices = @transform_1, window_bounds = array<i64: 16, 128>}, {transform_indices = @transform_2, window_bounds = array<i64: 16, 128>}, {transform_indices = @transform_3, window_bounds = array<i64: 16, 128>}]} {
    %c0 = arith.constant 0 : index
    %c0_0 = arith.constant 0 : index
    %0 = vector.load %arg1[%c0, %c0_0] : memref<16x128xf32, #tpu.memory_space<vmem>>, vector<16x128xf32>
    %c0_1 = arith.constant 0 : index
    %c0_2 = arith.constant 0 : index
    %1 = vector.load %arg3[%c0_1, %c0_2] : memref<16x128xf32, #tpu.memory_space<vmem>>, vector<16x128xf32>
    tpu.vector_store %arg3[%c0_1, %c0_2], %0 {strides = array<i32>} : memref<16x128xf32, #tpu.memory_space<vmem>>, vector<16x128xf32>,
    %c0_3 = arith.constant 0 : index
    %c0_4 = arith.constant 0 : index
    %2 = vector.load %arg2[%c0_3, %c0_4] : memref<16x128xf32, #tpu.memory_space<vmem>>, vector<16x128xf32>
    %c0_5 = arith.constant 0 : index
    %c0_6 = arith.constant 0 : index
    %3 = vector.load %arg4[%c0_5, %c0_6] : memref<16x128xf32, #tpu.memory_space<vmem>>, vector<16x128xf32>
    tpu.vector_store %arg4[%c0_5, %c0_6], %2 {strides = array<i32>} : memref<16x128xf32, #tpu.memory_space<vmem>>, vector<16x128xf32>,
    return
  }
  func.func @transform_0(%arg0: i32) -> (i32, i32) {
    %c0_i32 = arith.constant 0 : i32
    %c0_i32_0 = arith.constant 0 : i32
    return %arg0, %c0_i32 : i32, i32
  }
  func.func @transform_1(%arg0: i32) -> (i32, i32) {
    %c0_i32 = arith.constant 0 : i32
    %c0_i32_0 = arith.constant 0 : i32
    return %arg0, %c0_i32 : i32, i32
  }
  func.func @transform_2(%arg0: i32) -> (i32, i32) {
    %c0_i32 = arith.constant 0 : i32
    %c0_i32_0 = arith.constant 0 : i32
    return %arg0, %c0_i32 : i32, i32
  }
  func.func @transform_3(%arg0: i32) -> (i32, i32) {
    %c0_i32 = arith.constant 0 : i32
    %c0_i32_0 = arith.constant 0 : i32
    return %arg0, %c0_i32 : i32, i32
  }
}

</mosaic_0001>

<bundles_post_ra>
// kernel: tpu_custom_call.1
= control target key start
LH: loop header
LB: loop body
LE: loop exit
PB: predicated region body
PF: predicated region fallthrough
CT: control target
= control target key end

     0   :  { %9 = vsyncpa [#allocation3], 0  ;;  %s253_s0 = inlined_call_operand.hbm [shape: f32[16,128], index: 0, kind: input, shape index: {}]   ;;  %s254_s1 = inlined_call_operand.hbm [shape: f32[16,128], index: 1, kind: input, shape index: {}]   ;;  %s255_s2 = inlined_call_operand.hbm [shape: f32[16,128], index: 2, kind: output, shape index: {0}]   ;;  %s256_s3 = inlined_call_operand.hbm [shape: f32[16,128], index: 3, kind: output, shape index: {1}]  }
   0x1   :  { %10 = vsyncpa [#allocation6], 0 }
   0x2   :  { %11 = vsyncpa [#allocation4], 0 }
   0x3   :  { %12 = vsyncpa [#allocation9], 0  ;;  %s17_s14 = sshll.u32 %s253_s0, 4  ;;  %s203_s15 = smov [#allocation2]   ;;  %s18_s14 = int_to_ptr.hbm [resolvable:$true] %s17_s14 }
   0x4   :  { %s19_s16 = sshll.u32 %s203_s15, 4  ;;  %s30_s19 = sshll.u32 %s254_s1, 4  ;;  %s20_s16 = int_to_ptr.vmem [resolvable:$true] %s19_s16  ;;  %s31_s19 = int_to_ptr.hbm [resolvable:$true] %s30_s19 }
   0x5   :  { %s204_s20 = smov 128   ;;  %s205_s21 = smov 8  }
   0x6   :  { %25 = dma.hbm_to_vmem [thread:$0]  %s18_s14, 256, %s20_s16, [#allocation3], %s204_s20, %s204_s20, %s205_s21  }
   0x7   :  { %s206_s22 = smov [#allocation5]  }
   0x8   :  { %s32_s23 = sshll.u32 %s206_s22, 4  ;;  %s33_s23 = int_to_ptr.vmem [resolvable:$true] %s32_s23 }
   0x9   :  { %38 = dma.hbm_to_vmem [thread:$0]  %s31_s19, 256, %s33_s23, [#allocation6], %s204_s20, %s204_s20, %s205_s21  }
   0xa   :  { %195 = dma.done.wait [#allocation3], 256  }
   0xb   :  { %196 = vsyncadd [#allocation3], 4294967040 }
   0xc   :  { %197 = dma.done.wait [#allocation6], 256  }
   0xd   :  { %198 = vsyncadd [#allocation6], 4294967040  ;;  %s207_s0 = smov [#allocation7]   ;;  %s61_s26 = sshll.u32 %s255_s2, 4  ;;  %v47_v0 = vld [vmem:[#allocation2] sm:$0xff]  ;;  %v48_v1 = vld [vmem:[#allocation2 + $0x8] sm:$0xff]  ;;  %s62_s26 = int_to_ptr.hbm [resolvable:$true] %s61_s26 }
   0xe   :  { %s59_s1 = sshll.u32 %s207_s0, 4  ;;  %s208_s27 = smov [#allocation8]   ;;  %v51_v2 = vld [vmem:[#allocation5] sm:$0xff]  ;;  %49 = vst [vmem:[#allocation7] sm:$0xff] %v47_v0  ;;  %v52_v3 = vld [vmem:[#allocation5 + $0x8] sm:$0xff]  ;;  %s60_s1 = int_to_ptr.vmem [resolvable:$true] %s59_s1 }
   0xf   :  { %s72_s28 = sshll.u32 %s208_s27, 4  ;;  %s74_s4 = sshll.u32 %s256_s3, 4  ;;  %50 = vst [vmem:[#allocation7 + $0x8] sm:$0xff] %v48_v1  ;;  %s73_s28 = int_to_ptr.vmem [resolvable:$true] %s72_s28  ;;  %s75_s4 = int_to_ptr.hbm [resolvable:$true] %s74_s4 }
  0x10   :  { %53 = vst [vmem:[#allocation8] sm:$0xff] %v51_v2  ;;  %67 = dma.vmem_to_hbm [thread:$0]  %s60_s1, 256, %s62_s26, [#allocation4], %s204_s20, %s204_s20, %s205_s21  }
  0x11   :  { %54 = vst [vmem:[#allocation8 + $0x8] sm:$0xff] %v52_v3 }
  0x12   :  { %80 = dma.vmem_to_hbm [thread:$0]  %s73_s28, 256, %s75_s4, [#allocation9], %s204_s20, %s204_s20, %s205_s21  }
  0x13   :  { %199 = dma.done.wait [#allocation4], 256  }
  0x14   :  { %200 = vsyncadd [#allocation4], 4294967040 }
  0x15   :  { %201 = dma.done.wait [#allocation9], 256  }
  0x16   :  { %202 = vsyncadd [#allocation9], 4294967040 }
  0x17   :  { %89 = vsyncpa [#allocation3], 1 }
  0x18   :  { %90 = vsyncpa [#allocation6], 1 }
  0x19   :  { %91 = vsyncpa [#allocation4], 1 }
  0x1a   :  { %92 = vsyncpa [#allocation9], 1 }

</bundles_post_ra>
